<compile_context>
chip_gen: v7x
topology: tpu7x:2x2x1
jax: 0.10.0
libtpu: 0.0.40
codegen_flags: <defaults>
</compile_context>

<pallas_src>
import numpy as np
import jax
import jax.numpy as jnp
from jax.experimental import pallas as pl
from jax.experimental.pallas import tpu as pltpu


# ----------------------------------------------------------------------------
# Synthetic connectivity construction (mirrors brain_region / syn_within_region /
# syn_cross_region from the PyTorch script, with deterministic JAX RNG).
# ----------------------------------------------------------------------------
def brain_region(neuron_num):
    region, start, end = [], 0, 0
    for n in neuron_num:
        end += int(n)
        region.append([start, end])
        start = end
    return np.array(region, dtype=np.int32)


def syn_within_region(key, syn_num, region):
    chunks = []
    for (start, end) in region:
        key, sub = jax.random.split(key)
        size = (end - start) * syn_num
        chunks.append(jax.random.randint(sub, (size, 2), start, end, dtype=jnp.int32))
    return jnp.concatenate(chunks, axis=0), key


def syn_cross_region(key, weight_matrix, region):
    chunks = []
    R = len(weight_matrix)
    for i in range(R):
        for j in range(R):
            w = int(weight_matrix[i][j])
            if w < 10:
                continue
            key, k1 = jax.random.split(key)
            key, k2 = jax.random.split(key)
            pre = jax.random.randint(k1, (w, 1), int(region[j][0]), int(region[j][1]), dtype=jnp.int32)
            post = jax.random.randint(k2, (w, 1), int(region[i][0]), int(region[i][1]), dtype=jnp.int32)
            chunks.append(jnp.concatenate([post, pre], axis=1))
    return jnp.concatenate(chunks, axis=0), key


# ----------------------------------------------------------------------------
# Tile helper: largest multiple of 128 that divides n and is <= target
# (falls back to n itself, which is always a legal full-extent block).
# ----------------------------------------------------------------------------
def _pick_tile(n, target):
    best = None
    t = 128
    while t <= min(n, target):
        if n % t == 0:
            best = t
        t += 128
    return best if best is not None else n


# ----------------------------------------------------------------------------
# Stage 1 kernel: elementwise synapse/neuron state update (per lane tile)
#   Iback' = Iback + dt_over_tau * (noise - Iback)
#   Ieff   = Iback' / sqrt_coeff * sig + mu
#   s'     = s + lamda_r * (-s + (1/tao_d) * spike)
#   r'     = r - lamda_d * r + dt * s'
# ----------------------------------------------------------------------------
def make_state_kernel(c):
    dt_over_tau = c["dt_over_tau"]
    sig_over_sqrt = c["sig"] / c["sqrt_coeff"]   # fold divide into one multiply
    mu = c["mu"]
    lamda_r = c["lamda_r"]
    lamda_d = c["lamda_d"]
    dt = c["dt"]
    inv_tao_d = c["inv_tao_d"]

    def kernel(iback_ref, noise_ref, spike_ref, s_ref, r_ref,
               iback_o, ieff_o, s_o, r_o):
        iback_new = iback_ref[...] + dt_over_tau * (noise_ref[...] - iback_ref[...])
        ieff = iback_new * sig_over_sqrt + mu
        s_new = s_ref[...] + lamda_r * (-s_ref[...] + inv_tao_d * spike_ref[...])
        r_new = r_ref[...] - lamda_d * r_ref[...] + dt * s_new
        iback_o[...] = iback_new
        ieff_o[...] = ieff
        s_o[...] = s_new
        r_o[...] = r_new

    return kernel


# ----------------------------------------------------------------------------
# Stage 2 kernel:
#   I[:, j*TN:(j+1)*TN] = sum_k r_new[:, k*TK:(k+1)*TK] @ Wt[k*TK.., j*TN..] + Ieff tile
# Output block is resident across the (inner, "arbitrary") k axis and is used
# directly as the f32 accumulator; the column axis j is "parallel".
# ----------------------------------------------------------------------------
def current_kernel(r_ref, wt_ref, ieff_ref, i_ref):
    k = pl.program_id(1)

    @pl.when(k == 0)
    def _():
        i_ref[...] = ieff_ref[...]

    # bf16 weights streamed once from HBM, upcast in-register for exact f32 accumulation.
    i_ref[...] += jnp.dot(r_ref[...], wt_ref[...].astype(jnp.float32),
                          preferred_element_type=jnp.float32)


# ----------------------------------------------------------------------------
# Wrapper: one brain.forward step (Syn current). All state vectors are (1, N) f32.
# wt_bf16 is the PRE-TRANSPOSED weight matrix Wt[pre, post], stored in bf16.
# ----------------------------------------------------------------------------
def brain_forward(wt_bf16, iback, noise, spike, s, r, consts,
                  *, tn_target=512, tk_target=2048):
    N = wt_bf16.shape[0]
    assert wt_bf16.shape == (N, N)
    vec = jax.ShapeDtypeStruct((1, N), jnp.float32)

    # ---- Stage 1: elementwise state update, lane-tiled, fully parallel ----
    TS = _pick_tile(N, 2048)
    tile_spec = pl.BlockSpec((1, TS), lambda i: (0, i))
    iback_new, ieff, s_new, r_new = pl.pallas_call(
        make_state_kernel(consts),
        out_shape=(vec,) * 4,
        grid_spec=pltpu.PrefetchScalarGridSpec(
            num_scalar_prefetch=0,
            grid=(N // TS,),
            in_specs=[tile_spec] * 5,
            out_specs=[tile_spec] * 4,
        ),
        compiler_params=pltpu.CompilerParams(dimension_semantics=("parallel",)),
    )(iback, noise, spike, s, r)

    # ---- Stage 2: synaptic current matvec + Ieff add ----
    TN = _pick_tile(N, tn_target)   # output-column tile (lane dim of I)
    TK = _pick_tile(N, tk_target)   # contraction tile (pre-neuron dim)
    grid = (N // TN, N // TK)

    # Explicit scoped-VMEM budget: double-buffered Wt block (bf16) + r/ieff/out
    # blocks (f32), with 2x headroom; cap below the smallest physical VMEM (v7x 64 MiB).
    per_step = TK * TN * 2 + TK * 4 + 2 * TN * 4 + TN * 4
    vmem_bytes = int(min(max(4 * per_step, 16 << 20), 60 << 20))

    I = pl.pallas_call(
        current_kernel,
        out_shape=vec,
        grid_spec=pltpu.PrefetchScalarGridSpec(
            num_scalar_prefetch=0,
            grid=grid,
            in_specs=[
                pl.BlockSpec((1, TK), lambda j, k: (0, k)),   # r_new K-tile
                pl.BlockSpec((TK, TN), lambda j, k: (k, j)),  # Wt (pre, post) tile, bf16
                pl.BlockSpec((1, TN), lambda j, k: (0, j)),   # Ieff column tile
            ],
            out_specs=pl.BlockSpec((1, TN), lambda j, k: (0, j)),  # I column tile (accumulator)
        ),
        compiler_params=pltpu.CompilerParams(
            dimension_semantics=("parallel", "arbitrary"),
            vmem_limit_bytes=vmem_bytes,
        ),
    )(r_new, wt_bf16, ieff)

    return I, iback_new, ieff, s_new, r_new


# ----------------------------------------------------------------------------
# Plain-JAX/numpy reference (mirrors Syn.forward)
# ----------------------------------------------------------------------------
def reference(W, iback, noise, spike, s, r, c):
    iback_new = iback + c["dt_over_tau"] * (noise - iback)
    ieff = iback_new / c["sqrt_coeff"] * c["sig"] + c["mu"]
    s_new = s + c["lamda_r"] * (-s + c["inv_tao_d"] * spike)
    r_new = r - c["lamda_d"] * r + c["dt"] * s_new
    I = W @ r_new + ieff
    return I, iback_new, ieff, s_new, r_new


if __name__ == "__main__":
    key = jax.random.PRNGKey(0)

    # --- synthetic "brain" setup (small) -------------------------------------
    neuron_num = [128, 128]                       # two regions
    N = int(sum(neuron_num))                      # total neurons = 256
    regions = brain_region(neuron_num)

    syn_1, key = syn_within_region(key, 10, regions)
    weight_matrix = np.array([[0, 64], [64, 0]], dtype=np.int32)
    syn_2, key = syn_cross_region(key, weight_matrix, regions)
    syn = jnp.concatenate([syn_1, syn_2], axis=0)          # (num_syn, 2) = [post, pre]
    weight = -jnp.ones((syn.shape[0],), dtype=jnp.float32)

    # Dense equivalent of torch.sparse_coo_tensor (duplicate indices accumulate).
    W = jnp.zeros((N, N), dtype=jnp.float32).at[syn[:, 0], syn[:, 1]].add(weight)
    # Weights are small negative integers -> exactly representable in bf16.
    Wt_bf16 = W.T.astype(jnp.bfloat16)            # Wt[pre, post], halves HBM traffic

    # --- Syn / neuron constants (neuron attrs are synthetic but deterministic) ---
    dt, tao_d, tao_r = 0.1, 3.0, 6.0
    consts = dict(
        dt=dt,
        inv_tao_d=1.0 / tao_d,
        lamda_d=dt / tao_d,
        lamda_r=dt / tao_r,
        dt_over_tau=0.05,
        sqrt_coeff=float(np.sqrt(0.05 / 2.0)),
        sig=5.0,
        mu=10.0,
    )

    # --- state vectors ---------------------------------------------------------
    key, k_noise, k_spike = jax.random.split(key, 3)
    iback = jnp.zeros((N,), jnp.float32)
    s = jnp.zeros((N,), jnp.float32)
    r = jnp.zeros((N,), jnp.float32)
    # Deterministic stand-in for the torch.randn drawn inside Syn.forward
    # (passed as an input so the kernel can be checked bit-for-bit vs the reference).
    noise = jax.random.normal(k_noise, (N,), jnp.float32)
    spike = jax.random.bernoulli(k_spike, 0.1, (N,)).astype(jnp.float32)

    row = lambda v: v.reshape(1, N).astype(jnp.float32)
    out = brain_forward(Wt_bf16, row(iback), row(noise), row(spike), row(s), row(r), consts)
    out = jax.block_until_ready(out)
    I_k, iback_k, ieff_k, s_k, r_k = [np.asarray(o).reshape(N) for o in out]

    # --- correctness check vs plain-JAX reference ------------------------------
    # Use the bf16-rounded weights (exact here) so the reference matches the kernel's W.
    W_used = np.asarray(Wt_bf16.astype(jnp.float32)).T
    I_r, iback_r, ieff_r, s_r, r_r = reference(W_used, np.asarray(iback),
                                               np.asarray(noise), np.asarray(spike),
                                               np.asarray(s), np.asarray(r), consts)
    np.testing.assert_allclose(I_k, I_r, rtol=2e-5, atol=2e-5)
    np.testing.assert_allclose(iback_k, iback_r, rtol=2e-5, atol=2e-5)
    np.testing.assert_allclose(ieff_k, ieff_r, rtol=2e-5, atol=2e-5)
    np.testing.assert_allclose(s_k, s_r, rtol=2e-5, atol=2e-5)
    np.testing.assert_allclose(r_k, r_r, rtol=2e-5, atol=2e-5)

    print("KERNEL_OK")
</pallas_src>

<mosaic_0001>
module attributes {stable_mosaic.version = 11 : i64} {
  func.func @kernel(%arg0: i32, %arg1: memref<1x256xf32, #tpu.memory_space<vmem>>, %arg2: memref<1x256xf32, #tpu.memory_space<vmem>>, %arg3: memref<1x256xf32, #tpu.memory_space<vmem>>, %arg4: memref<1x256xf32, #tpu.memory_space<vmem>>, %arg5: memref<1x256xf32, #tpu.memory_space<vmem>>, %arg6: memref<1x256xf32, #tpu.memory_space<vmem>>, %arg7: memref<1x256xf32, #tpu.memory_space<vmem>>, %arg8: memref<1x256xf32, #tpu.memory_space<vmem>>, %arg9: memref<1x256xf32, #tpu.memory_space<vmem>>) attributes {dimension_semantics = [#tpu.dimension_semantics<parallel>], iteration_bounds = array<i64: 1>, scalar_prefetch = 0 : i64, scratch_operands = 0 : i64, tpu.core_type = #tpu.core_type<tc>, window_params = [{transform_indices = @transform_0, window_bounds = array<i64: 1, 256>}, {transform_indices = @transform_1, window_bounds = array<i64: 1, 256>}, {transform_indices = @transform_2, window_bounds = array<i64: 1, 256>}, {transform_indices = @transform_3, window_bounds = array<i64: 1, 256>}, {transform_indices = @transform_4, window_bounds = array<i64: 1, 256>}, {transform_indices = @transform_5, window_bounds = array<i64: 1, 256>}, {transform_indices = @transform_6, window_bounds = array<i64: 1, 256>}, {transform_indices = @transform_7, window_bounds = array<i64: 1, 256>}, {transform_indices = @transform_8, window_bounds = array<i64: 1, 256>}]} {
    %c0 = arith.constant 0 : index
    %c0_0 = arith.constant 0 : index
    %0 = vector.load %arg1[%c0, %c0_0] : memref<1x256xf32, #tpu.memory_space<vmem>>, vector<1x256xf32>
    %c0_1 = arith.constant 0 : index
    %c0_2 = arith.constant 0 : index
    %1 = vector.load %arg2[%c0_1, %c0_2] : memref<1x256xf32, #tpu.memory_space<vmem>>, vector<1x256xf32>
    %c0_3 = arith.constant 0 : index
    %c0_4 = arith.constant 0 : index
    %2 = vector.load %arg1[%c0_3, %c0_4] : memref<1x256xf32, #tpu.memory_space<vmem>>, vector<1x256xf32>
    %3 = arith.subf %1, %2 : vector<1x256xf32>
    %cst = arith.constant 5.000000e-02 : f32
    %4 = vector.broadcast %cst : f32 to vector<1x256xf32>
    %5 = arith.mulf %4, %3 : vector<1x256xf32>
    %6 = arith.addf %0, %5 : vector<1x256xf32>
    %cst_5 = arith.constant 31.622776 : f32
    %7 = vector.broadcast %cst_5 : f32 to vector<1x256xf32>
    %8 = arith.mulf %6, %7 : vector<1x256xf32>
    %cst_6 = arith.constant 1.000000e+01 : f32
    %9 = vector.broadcast %cst_6 : f32 to vector<1x256xf32>
    %10 = arith.addf %8, %9 : vector<1x256xf32>
    %c0_7 = arith.constant 0 : index
    %c0_8 = arith.constant 0 : index
    %11 = vector.load %arg4[%c0_7, %c0_8] : memref<1x256xf32, #tpu.memory_space<vmem>>, vector<1x256xf32>
    %c0_9 = arith.constant 0 : index
    %c0_10 = arith.constant 0 : index
    %12 = vector.load %arg4[%c0_9, %c0_10] : memref<1x256xf32, #tpu.memory_space<vmem>>, vector<1x256xf32>
    %cst_11 = arith.constant 0.000000e+00 : f32
    %13 = vector.broadcast %cst_11 : f32 to vector<1x256xf32>
    %14 = arith.subf %13, %12 : vector<1x256xf32>
    %c0_12 = arith.constant 0 : index
    %c0_13 = arith.constant 0 : index
    %15 = vector.load %arg3[%c0_12, %c0_13] : memref<1x256xf32, #tpu.memory_space<vmem>>, vector<1x256xf32>
    %cst_14 = arith.constant 0.333333343 : f32
    %16 = vector.broadcast %cst_14 : f32 to vector<1x256xf32>
    %17 = arith.mulf %16, %15 : vector<1x256xf32>
    %18 = arith.addf %14, %17 : vector<1x256xf32>
    %cst_15 = arith.constant 0.0166666675 : f32
    %19 = vector.broadcast %cst_15 : f32 to vector<1x256xf32>
    %20 = arith.mulf %19, %18 : vector<1x256xf32>
    %21 = arith.addf %11, %20 : vector<1x256xf32>
    %c0_16 = arith.constant 0 : index
    %c0_17 = arith.constant 0 : index
    %22 = vector.load %arg5[%c0_16, %c0_17] : memref<1x256xf32, #tpu.memory_space<vmem>>, vector<1x256xf32>
    %c0_18 = arith.constant 0 : index
    %c0_19 = arith.constant 0 : index
    %23 = vector.load %arg5[%c0_18, %c0_19] : memref<1x256xf32, #tpu.memory_space<vmem>>, vector<1x256xf32>
    %cst_20 = arith.constant 0.0333333351 : f32
    %24 = vector.broadcast %cst_20 : f32 to vector<1x256xf32>
    %25 = arith.mulf %24, %23 : vector<1x256xf32>
    %26 = arith.subf %22, %25 : vector<1x256xf32>
    %cst_21 = arith.constant 1.000000e-01 : f32
    %27 = vector.broadcast %cst_21 : f32 to vector<1x256xf32>
    %28 = arith.mulf %27, %21 : vector<1x256xf32>
    %29 = arith.addf %26, %28 : vector<1x256xf32>
    %c0_22 = arith.constant 0 : index
    %c0_23 = arith.constant 0 : index
    %30 = vector.load %arg6[%c0_22, %c0_23] : memref<1x256xf32, #tpu.memory_space<vmem>>, vector<1x256xf32>
    tpu.vector_store %arg6[%c0_22, %c0_23], %6 {strides = array<i32>} : memref<1x256xf32, #tpu.memory_space<vmem>>, vector<1x256xf32>,
    %c0_24 = arith.constant 0 : index
    %c0_25 = arith.constant 0 : index
    %31 = vector.load %arg7[%c0_24, %c0_25] : memref<1x256xf32, #tpu.memory_space<vmem>>, vector<1x256xf32>
    tpu.vector_store %arg7[%c0_24, %c0_25], %10 {strides = array<i32>} : memref<1x256xf32, #tpu.memory_space<vmem>>, vector<1x256xf32>,
    %c0_26 = arith.constant 0 : index
    %c0_27 = arith.constant 0 : index
    %32 = vector.load %arg8[%c0_26, %c0_27] : memref<1x256xf32, #tpu.memory_space<vmem>>, vector<1x256xf32>
    tpu.vector_store %arg8[%c0_26, %c0_27], %21 {strides = array<i32>} : memref<1x256xf32, #tpu.memory_space<vmem>>, vector<1x256xf32>,
    %c0_28 = arith.constant 0 : index
    %c0_29 = arith.constant 0 : index
    %33 = vector.load %arg9[%c0_28, %c0_29] : memref<1x256xf32, #tpu.memory_space<vmem>>, vector<1x256xf32>
    tpu.vector_store %arg9[%c0_28, %c0_29], %29 {strides = array<i32>} : memref<1x256xf32, #tpu.memory_space<vmem>>, vector<1x256xf32>,
    return
  }
  func.func @transform_0(%arg0: i32) -> (i32, i32) {
    %c0_i32 = arith.constant 0 : i32
    %c0_i32_0 = arith.constant 0 : i32
    return %c0_i32, %arg0 : i32, i32
  }
  func.func @transform_1(%arg0: i32) -> (i32, i32) {
    %c0_i32 = arith.constant 0 : i32
    %c0_i32_0 = arith.constant 0 : i32
    return %c0_i32, %arg0 : i32, i32
  }
  func.func @transform_2(%arg0: i32) -> (i32, i32) {
    %c0_i32 = arith.constant 0 : i32
    %c0_i32_0 = arith.constant 0 : i32
    return %c0_i32, %arg0 : i32, i32
  }
  func.func @transform_3(%arg0: i32) -> (i32, i32) {
    %c0_i32 = arith.constant 0 : i32
    %c0_i32_0 = arith.constant 0 : i32
    return %c0_i32, %arg0 : i32, i32
  }
  func.func @transform_4(%arg0: i32) -> (i32, i32) {
    %c0_i32 = arith.constant 0 : i32
    %c0_i32_0 = arith.constant 0 : i32
    return %c0_i32, %arg0 : i32, i32
  }
  func.func @transform_5(%arg0: i32) -> (i32, i32) {
    %c0_i32 = arith.constant 0 : i32
    %c0_i32_0 = arith.constant 0 : i32
    return %c0_i32, %arg0 : i32, i32
  }
  func.func @transform_6(%arg0: i32) -> (i32, i32) {
    %c0_i32 = arith.constant 0 : i32
    %c0_i32_0 = arith.constant 0 : i32
    return %c0_i32, %arg0 : i32, i32
  }
  func.func @transform_7(%arg0: i32) -> (i32, i32) {
    %c0_i32 = arith.constant 0 : i32
    %c0_i32_0 = arith.constant 0 : i32
    return %c0_i32, %arg0 : i32, i32
  }
  func.func @transform_8(%arg0: i32) -> (i32, i32) {
    %c0_i32 = arith.constant 0 : i32
    %c0_i32_0 = arith.constant 0 : i32
    return %c0_i32, %arg0 : i32, i32
  }
}

</mosaic_0001>

<bundles_post_ra>
// kernel: tpu_custom_call.1
= control target key start
LH: loop header
LB: loop body
LE: loop exit
PB: predicated region body
PF: predicated region fallthrough
CT: control target
= control target key end

     0   :  { %14 = vsyncpa [#allocation3], 0  ;;  %s393_s0 = inlined_call_operand.hbm [shape: f32[1,256], index: 0, kind: input, shape index: {}]   ;;  %s394_s1 = inlined_call_operand.vmem [shape: f32[1,256], index: 1, kind: input, shape index: {}]   ;;  %s395_s2 = inlined_call_operand.vmem [shape: f32[1,256], index: 2, kind: input, shape index: {}]   ;;  %s396_s3 = inlined_call_operand.vmem [shape: f32[1,256], index: 3, kind: input, shape index: {}]   ;;  %s397_s4 = inlined_call_operand.vmem [shape: f32[1,256], index: 4, kind: input, shape index: {}]   ;;  %s398_s5 = inlined_call_operand.hbm [shape: f32[1,256], index: 5, kind: output, shape index: {0}]   ;;  %s399_s6 = inlined_call_operand.hbm [shape: f32[1,256], index: 6, kind: output, shape index: {1}]   ;;  %s400_s7 = inlined_call_operand.hbm [shape: f32[1,256], index: 7, kind: output, shape index: {2}]   ;;  %s401_s8 = inlined_call_operand.hbm [shape: f32[1,256], index: 8, kind: output, shape index: {3}]  }
   0x1   :  { %15 = vsyncpa [#allocation4], 0 }
   0x2   :  { %16 = vsyncpa [#allocation7], 0 }
   0x3   :  { %17 = vsyncpa [#allocation10], 0  ;;  %s245_s27 = smov [#allocation2]   ;;  %s127_s9 = scalar_lea.hbm %s393_s0, 32 }
   0x4   :  { %s24_s28 = sshll.u32 %s245_s27, 4  ;;  %p128_p0 = scmp.ne.s32.totalorder %s393_s0, %s127_s9  ;;  %s25_s28 = int_to_ptr.vmem [resolvable:$true] %s24_s28 }
   0x5   :  { %p131_p1 = scmp.lt.u32.totalorder %s127_s9, %s393_s0 }
   0x7   :  { %p133_p2 = pnand %p131_p1, %p128_p0 }
   0x9   :  { %136 = shalt.err (!%p133_p2)
}
   0xa   :  { %s137_s14 = scalar_lea.vmem %s25_s28, 32  ;;  %p142_p4 = scmp.lt.s32.totalorder %s25_s28, %s25_s28 }
   0xb   :  { %p138_p3 = scmp.ne.s32.totalorder %s25_s28, %s137_s14  ;;  %p143_p5 = scmp.lt.s32.totalorder %s137_s14, %s137_s14 }
   0xd   :  { %p144_p6 = por %p143_p5, %p142_p4 }
   0xf   :  { %p145_p7 = pnand %p144_p6, %p138_p3 }
  0x11   :  { %148 = shalt.err (!%p145_p7)
}
  0x12   :  { %27 = dma.hbm_to_vmem [thread:$0]  %s393_s0, 32, %s25_s28, [#allocation3]  }
  0x13   :  { %237 = dma.done.wait [#allocation3], 32  }
  0x14   :  { %238 = vsyncadd [#allocation3], 4294967264  ;;  %v39_v0 = vld [vmem:[#allocation2] sm:$0x3]  ;;  %v58_v2 = vlaneseq  ;;  %s246_s24 = smov [#allocation5]   ;;  %s249_s26 = smov [#allocation9]  }
  0x15   :  { %v40_v1 = vld [vmem:[%s394_s1] sm:$0x3]  ;;  %s72_s25 = sshll.u32 %s246_s24, 4  ;;  %s247_s1 = smov [#allocation6]   ;;  %s73_s25 = int_to_ptr.vmem [resolvable:$true] %s72_s25 }
  0x16   :  { %v46_v3 = vld [vmem:[%s396_s3] sm:$0x3]  ;;  %v41_v4 = vsub.f32 %v40_v1, %v39_v0  ;;  %vm319_vm0 = vcmp.lt.s32.totalorder %v58_v2, 256  ;;  %s82_s3 = sshll.u32 %s247_s1, 4  ;;  %s102_s27 = sshll.u32 %s249_s26, 4  ;;  %s83_s3 = int_to_ptr.vmem [resolvable:$true] %s82_s3  ;;  %s343_s27 = int_to_ptr.vmem [resolvable:$true] %s102_s27 }
  0x17   :  { %v47_v5 = vsub.f32 0.0, %v46_v3  ;;  %v48_v6 = vld [vmem:[%s395_s2] sm:$0x3]  ;;  %s248_s2 = smov [#allocation8]   ;;  %s149_s28 = scalar_lea.vmem %s73_s25, 32 }
  0x18   :  { %v53_v7 = vld [vmem:[%s397_s4] sm:$0x3]  ;;  %v49_v8 = vmul.f32 0.33333334, %v48_v6  ;;  %v42_v9 = vmul.f32 0.05, %v41_v4  ;;  %p150_p8 = scmp.ne.s32.totalorder %s73_s25, %s149_s28  ;;  %p154_p9 = scmp.lt.s32.totalorder %s73_s25, %s73_s25 }
  0x19   :  { %v54_v12 = vmul.f32 0.033333335, %v53_v7  ;;  %s92_s4 = sshll.u32 %s248_s2, 4  ;;  %p155_p10 = scmp.lt.s32.totalorder %s149_s28, %s149_s28  ;;  %s339_s4 = int_to_ptr.vmem [resolvable:$true] %s92_s4 }
  0x1a   :  { %v50_v11 = vadd.f32 %v49_v8, %v47_v5  ;;  %v43_v13 = vadd.f32 %v42_v9, %v39_v0 }
  0x1b   :  { %v55_v17 = vsub.f32 %v53_v7, %v54_v12  ;;  %p156_p11 = por %p155_p10, %p154_p9 }
  0x1c   :  { %v51_v14 = vmul.f32 0.016666668, %v50_v11  ;;  %v44_v15 = vmul.f32 31.622776, %v43_v13  ;;  %62 = vst.msk [vmem:[#allocation5] sm:$0x3] %vm319_vm0, %v43_v13 }
  0x1d   :  { %p157_p12 = pnand %p156_p11, %p150_p8 }
  0x1e   :  { %v52_v16 = vadd.f32 %v51_v14, %v46_v3 }
  0x1f   :  { %160 = shalt.err (!%p157_p12)
}
  0x20   :  { %s161_s9 = scalar_lea.hbm %s398_s5, 32 }
  0x21   :  { %p162_p13 = scmp.ne.s32.totalorder %s398_s5, %s161_s9  ;;  %p165_p0 = scmp.lt.u32.totalorder %s161_s9, %s398_s5 }
  0x23   :  { %p167_p1 = pnand %p165_p0, %p162_p13 }
  0x25   :  { %170 = shalt.err (!%p167_p1)
}
  0x26   :  { %75 = dma.vmem_to_hbm [thread:$0]  %s73_s25, 32, %s398_s5, [#allocation4]   ;;  %v45_v18 = vadd.f32 10.0, %v44_v15  ;;  %64 = vst.msk [vmem:[#allocation8] sm:$0x3] %vm319_vm0, %v52_v16 }
  0x27   :  { %v56_v19 = vmul.f32 0.1, %v52_v16  ;;  %s171_s16 = scalar_lea.vmem %s83_s3, 32  ;;  %p176_p3 = scmp.lt.s32.totalorder %s83_s3, %s83_s3 }
  0x28   :  { %63 = vst.msk [vmem:[#allocation6] sm:$0x3] %vm319_vm0, %v45_v18  ;;  %p172_p2 = scmp.ne.s32.totalorder %s83_s3, %s171_s16  ;;  %p177_p4 = scmp.lt.s32.totalorder %s171_s16, %s171_s16 }
  0x29   :  { %v57_v20 = vadd.f32 %v56_v19, %v55_v17 }
  0x2a   :  { %p178_p5 = por %p177_p4, %p176_p3 }
  0x2c   :  { %p179_p6 = pnand %p178_p5, %p172_p2 }
  0x2e   :  { %182 = shalt.err (!%p179_p6)
}
  0x2f   :  { %s183_s18 = scalar_lea.hbm %s399_s6, 32 }
  0x30   :  { %p184_p7 = scmp.ne.s32.totalorder %s399_s6, %s183_s18  ;;  %p187_p8 = scmp.lt.u32.totalorder %s183_s18, %s399_s6 }
  0x32   :  { %p189_p9 = pnand %p187_p8, %p184_p7 }
  0x34   :  { %192 = shalt.err (!%p189_p9)
}
  0x35   :  { %85 = dma.vmem_to_hbm [thread:$0]  %s83_s3, 32, %s399_s6, [#allocation7]  }
  0x36   :  { %s193_s24 = scalar_lea.vmem %s339_s4, 32  ;;  %p198_p11 = scmp.lt.s32.totalorder %s339_s4, %s339_s4 }
  0x37   :  { %p194_p10 = scmp.ne.s32.totalorder %s339_s4, %s193_s24  ;;  %p199_p12 = scmp.lt.s32.totalorder %s193_s24, %s193_s24 }
  0x39   :  { %p200_p13 = por %p199_p12, %p198_p11 }
  0x3b   :  { %p201_p0 = pnand %p200_p13, %p194_p10 }
  0x3d   :  { %204 = shalt.err (!%p201_p0)
}
  0x3e   :  { %s205_s2 = scalar_lea.hbm %s400_s7, 32 }
  0x3f   :  { %p206_p1 = scmp.ne.s32.totalorder %s400_s7, %s205_s2  ;;  %p209_p2 = scmp.lt.u32.totalorder %s205_s2, %s400_s7 }
  0x41   :  { %p211_p3 = pnand %p209_p2, %p206_p1 }
  0x43   :  { %214 = shalt.err (!%p211_p3)
}
  0x44   :  { %95 = dma.vmem_to_hbm [thread:$0]  %s339_s4, 32, %s400_s7, [#allocation7]   ;;  %65 = vst.msk [vmem:[#allocation9] sm:$0x3] %vm319_vm0, %v57_v20 }
  0x45   :  { %s215_s9 = scalar_lea.vmem %s343_s27, 32  ;;  %p220_p5 = scmp.lt.s32.totalorder %s343_s27, %s343_s27 }
  0x46   :  { %p216_p4 = scmp.ne.s32.totalorder %s343_s27, %s215_s9  ;;  %p221_p6 = scmp.lt.s32.totalorder %s215_s9, %s215_s9 }
  0x48   :  { %p222_p7 = por %p221_p6, %p220_p5 }
  0x4a   :  { %p223_p8 = pnand %p222_p7, %p216_p4 }
  0x4c   :  { %226 = shalt.err (!%p223_p8)
}
  0x4d   :  { %s227_s12 = scalar_lea.hbm %s401_s8, 32 }
  0x4e   :  { %p228_p9 = scmp.ne.s32.totalorder %s401_s8, %s227_s12  ;;  %p231_p10 = scmp.lt.u32.totalorder %s227_s12, %s401_s8 }
  0x50   :  { %p233_p11 = pnand %p231_p10, %p228_p9 }
  0x52   :  { %236 = shalt.err (!%p233_p11)
}
  0x53   :  { %105 = dma.vmem_to_hbm [thread:$0]  %s343_s27, 32, %s401_s8, [#allocation10]  }
  0x54   :  { %239 = dma.done.wait [#allocation4], 32  }
  0x55   :  { %240 = vsyncadd [#allocation4], 4294967264 }
  0x56   :  { %241 = dma.done.wait [#allocation7], 64  }
  0x57   :  { %242 = vsyncadd [#allocation7], 4294967232 }
  0x58   :  { %243 = dma.done.wait [#allocation10], 32  }
  0x59   :  { %244 = vsyncadd [#allocation10], 4294967264 }
  0x5a   :  { %118 = vsyncpa [#allocation3], 1 }
  0x5b   :  { %119 = vsyncpa [#allocation4], 1 }
  0x5c   :  { %120 = vsyncpa [#allocation7], 1 }
  0x5d   :  { %121 = vsyncpa [#allocation10], 1 }

</bundles_post_ra>
